<compile_context>
chip_gen: v7x
topology: tpu7x:2x2x1
jax: 0.10.0
libtpu: 0.0.40
codegen_flags: <defaults>
</compile_context>

<pallas_src>
import math
from typing import NamedTuple

import jax
import jax.numpy as jnp
from jax import lax
from jax.experimental import pallas as pl
from jax.experimental.pallas import tpu as pltpu

LANE = 128      # TPU vreg lane width
SUBLANE = 8     # TPU vreg sublane count


def _round_up(x, m):
    return (x + m - 1) // m * m


# ----------------------------- Pallas kernel --------------------------------
def _diffusion_embedding_kernel(step_ref, table_ref, w1_ref, b1_ref, w2_ref,
                                b2_ref, o_ref):
    # step_ref : (TILE_B, 1)        int32   (this batch tile's diffusion steps)
    # table_ref: (S_pad, K_pad)     compute_dtype  (VMEM-resident, padded)
    # w1_ref   : (K_pad, P_pad)     compute_dtype
    # b1_ref   : (1, P_pad)         f32
    # w2_ref   : (P_pad, P_pad)     compute_dtype
    # b2_ref   : (1, P_pad)         f32
    # o_ref    : (TILE_B, P_pad)    f32   (lane-dense: P_pad % 128 == 0)
    steps = step_ref[...]                                   # (TB, 1) int32
    tb = steps.shape[0]
    s_pad = table_ref.shape[0]

    # Fused embedding gather: one_hot(steps) @ table == table[steps] (exact:
    # the one-hot rows select exact bf16 table entries, f32 accumulation).
    # Runs on the MXU and vectorizes the whole batch tile.
    iota = lax.broadcasted_iota(jnp.int32, (tb, s_pad), 1)  # (TB, S_pad)
    onehot = (iota == steps).astype(table_ref.dtype)        # built in compute dtype
    x = jnp.dot(onehot, table_ref[...],
                preferred_element_type=jnp.float32)         # (TB, K_pad) f32

    # projection1 + SiLU (bias add + SiLU in f32; sigmoid -> EUP slot)
    h = jnp.dot(x.astype(w1_ref.dtype), w1_ref[...],
                preferred_element_type=jnp.float32) + b1_ref[...]
    h = h * jax.nn.sigmoid(h)

    # projection2 + SiLU
    y = jnp.dot(h.astype(w2_ref.dtype), w2_ref[...],
                preferred_element_type=jnp.float32) + b2_ref[...]
    y = y * jax.nn.sigmoid(y)

    o_ref[...] = y.astype(o_ref.dtype)


# ------------------------- Param prep (one-time) -----------------------------
class DiffusionEmbeddingParams(NamedTuple):
    table: jax.Array   # (S_pad, K_pad) compute_dtype
    w1: jax.Array      # (K_pad, P_pad) compute_dtype
    b1: jax.Array      # (1, P_pad)     f32
    w2: jax.Array      # (P_pad, P_pad) compute_dtype
    b2: jax.Array      # (1, P_pad)     f32
    proj_dim: int
    max_steps: int


def prepare_params(table, w1, b1, w2, b2, *, compute_dtype=jnp.bfloat16):
    """Pad feature dims to multiples of 128 (lane-dense) and cast dot operands.

    Done ONCE at init; zero padding is exact for the valid output columns.
    """
    max_steps, two_dim = table.shape
    assert w1.shape[0] == two_dim
    proj_dim = w1.shape[1]

    s_pad = _round_up(max_steps, LANE)
    k_pad = _round_up(two_dim, LANE)
    p_pad = _round_up(proj_dim, LANE)

    table_p = jnp.zeros((s_pad, k_pad), compute_dtype)
    table_p = table_p.at[:max_steps, :two_dim].set(table.astype(compute_dtype))
    w1_p = jnp.zeros((k_pad, p_pad), compute_dtype)
    w1_p = w1_p.at[:two_dim, :proj_dim].set(w1.astype(compute_dtype))
    w2_p = jnp.zeros((p_pad, p_pad), compute_dtype)
    w2_p = w2_p.at[:proj_dim, :proj_dim].set(w2.astype(compute_dtype))
    b1_p = jnp.zeros((1, p_pad), jnp.float32)
    b1_p = b1_p.at[0, :proj_dim].set(b1.reshape(-1).astype(jnp.float32))
    b2_p = jnp.zeros((1, p_pad), jnp.float32)
    b2_p = b2_p.at[0, :proj_dim].set(b2.reshape(-1).astype(jnp.float32))
    return DiffusionEmbeddingParams(table_p, w1_p, b1_p, w2_p, b2_p,
                                    proj_dim, max_steps)


# ------------------------------ Forward wrapper ------------------------------
def diffusion_embedding(diffusion_step, params: DiffusionEmbeddingParams,
                        *, tile_b=128, interpret=False):
    """diffusion_step: (B,) int32 -> (B, proj_dim) float32.

    Single fused pallas_call: gather + Linear/SiLU + Linear/SiLU.
    Batch is tiled over a parallel grid; weights/table stay VMEM-resident.
    """
    # TODO(synk): only integer diffusion steps (as in the provided forward);
    # out-of-range steps produce zero rows here rather than clamping/erroring.
    B = diffusion_step.shape[0]
    s_pad, k_pad = params.table.shape
    p_pad = params.w1.shape[1]

    tile_b = min(tile_b, _round_up(B, SUBLANE))
    b_pad = _round_up(B, tile_b)

    steps = diffusion_step.astype(jnp.int32).reshape(B, 1)
    if b_pad != B:                      # pad only when needed (skip extra copy)
        steps = jnp.zeros((b_pad, 1), jnp.int32).at[:B, :].set(steps)

    num_tiles = b_pad // tile_b
    itemsize = jnp.dtype(params.table.dtype).itemsize
    cost = pl.CostEstimate(
        flops=2 * num_tiles * tile_b * (s_pad * k_pad + k_pad * p_pad + p_pad * p_pad),
        transcendentals=2 * num_tiles * tile_b * p_pad,
        bytes_accessed=(b_pad * 4 + b_pad * p_pad * 4 + 2 * p_pad * 4
                        + (s_pad * k_pad + k_pad * p_pad + p_pad * p_pad) * itemsize),
    )

    out = pl.pallas_call(
        _diffusion_embedding_kernel,
        out_shape=jax.ShapeDtypeStruct((b_pad, p_pad), jnp.float32),
        grid_spec=pltpu.PrefetchScalarGridSpec(
            num_scalar_prefetch=0,
            grid=(num_tiles,),
            in_specs=[
                pl.BlockSpec((tile_b, 1), lambda i: (i, 0)),     # steps tile
                pl.BlockSpec((s_pad, k_pad), lambda i: (0, 0)),  # table (resident)
                pl.BlockSpec((k_pad, p_pad), lambda i: (0, 0)),  # W1    (resident)
                pl.BlockSpec((1, p_pad), lambda i: (0, 0)),      # b1
                pl.BlockSpec((p_pad, p_pad), lambda i: (0, 0)),  # W2    (resident)
                pl.BlockSpec((1, p_pad), lambda i: (0, 0)),      # b2
            ],
            out_specs=pl.BlockSpec((tile_b, p_pad), lambda i: (i, 0)),
        ),
        compiler_params=pltpu.CompilerParams(
            dimension_semantics=("parallel",),   # batch tiles shard across TCs (v7x)
        ),
        cost_estimate=cost,
        interpret=interpret,
    )(steps, params.table, params.w1, params.b1, params.w2, params.b2)

    if b_pad == B and p_pad == params.proj_dim:
        return out
    return out[:B, :params.proj_dim]


# ----------------------------- Module glue (JAX) -----------------------------
def build_embedding_table(dim, max_steps):
    # Matches the provided PyTorch module exactly: 10.0 ** (dims * 4.0 / dim).
    steps = jnp.arange(max_steps, dtype=jnp.float32)[:, None]      # (max_steps, 1)
    dims = jnp.arange(dim, dtype=jnp.float32)[None, :]             # (1, dim)
    table = steps * 10.0 ** (dims * 4.0 / dim)                     # (max_steps, dim)
    return jnp.concatenate([jnp.sin(table), jnp.cos(table)], axis=1)  # (max_steps, 2*dim)


def init_params(key, dim, proj_dim):
    """nn.Linear-style init (uniform +/- 1/sqrt(fan_in)); W stored (in, out)."""
    k1, k2, k3, k4 = jax.random.split(key, 4)
    in1 = dim * 2
    bound1 = 1.0 / math.sqrt(in1)
    bound2 = 1.0 / math.sqrt(proj_dim)
    w1 = jax.random.uniform(k1, (in1, proj_dim), jnp.float32, -bound1, bound1)
    b1 = jax.random.uniform(k2, (proj_dim,), jnp.float32, -bound1, bound1)
    w2 = jax.random.uniform(k3, (proj_dim, proj_dim), jnp.float32, -bound2, bound2)
    b2 = jax.random.uniform(k4, (proj_dim,), jnp.float32, -bound2, bound2)
    return w1, b1, w2, b2


def reference(diffusion_step, table, w1, b1, w2, b2, *, compute_dtype=jnp.float32):
    """Plain-JAX reference. compute_dtype mirrors the kernel's dot-operand dtype."""
    cd = compute_dtype
    x = table.astype(cd)[diffusion_step].astype(jnp.float32)
    h = jnp.dot(x.astype(cd), w1.astype(cd),
                preferred_element_type=jnp.float32) + b1.reshape(1, -1)
    h = h * jax.nn.sigmoid(h)
    y = jnp.dot(h.astype(cd), w2.astype(cd),
                preferred_element_type=jnp.float32) + b2.reshape(1, -1)
    y = y * jax.nn.sigmoid(y)
    return y


if __name__ == "__main__":
    dim = 16
    proj_dim = 32
    max_steps = 256     # module default
    batch = 20          # small demo batch; with tile_b=8 -> pads to 24, grid of 3

    key = jax.random.PRNGKey(0)
    k_step, k_param = jax.random.split(key)

    table = build_embedding_table(dim, max_steps)                  # (256, 32)
    w1, b1, w2, b2 = init_params(k_param, dim, proj_dim)
    diffusion_step = jax.random.randint(k_step, (batch,), 0, max_steps,
                                        dtype=jnp.int32)

    params = prepare_params(table, w1, b1, w2, b2, compute_dtype=jnp.bfloat16)

    # Small tile exercises padding + multi-tile grid; default (128) is used for
    # real batch sizes.
    out = diffusion_embedding(diffusion_step, params, tile_b=8)
    out = jax.block_until_ready(out)
    assert out.shape == (batch, proj_dim)

    # Tight check vs. a reference that mirrors the kernel's bf16 dot operands.
    ref_bf16 = reference(diffusion_step, table, w1, b1, w2, b2,
                         compute_dtype=jnp.bfloat16)
    assert jnp.allclose(out, ref_bf16, atol=5e-3, rtol=5e-3), "mismatch vs bf16 ref"

    # Semantics check vs. the exact f32 module math (bf16-precision tolerance).
    ref_f32 = reference(diffusion_step, table, w1, b1, w2, b2,
                        compute_dtype=jnp.float32)
    assert jnp.allclose(out, ref_f32, atol=2e-2, rtol=2e-2), "mismatch vs f32 ref"

    # Also exercise the default-tile path (grid of 1, no batch padding needed
    # beyond sublane rounding).
    out2 = jax.block_until_ready(diffusion_embedding(diffusion_step, params))
    assert jnp.allclose(out, out2, atol=1e-6, rtol=1e-6)

    print("KERNEL_OK")
</pallas_src>

<mosaic_0001>
module attributes {stable_mosaic.version = 11 : i64} {
  func.func @_diffusion_embedding_kernel(%arg0: i32, %arg1: memref<8x1xi32, #tpu.memory_space<vmem>>, %arg2: memref<256x128xbf16, #tpu.memory_space<vmem>>, %arg3: memref<128x128xbf16, #tpu.memory_space<vmem>>, %arg4: memref<1x128xf32, #tpu.memory_space<vmem>>, %arg5: memref<128x128xbf16, #tpu.memory_space<vmem>>, %arg6: memref<1x128xf32, #tpu.memory_space<vmem>>, %arg7: memref<8x128xf32, #tpu.memory_space<vmem>>) attributes {dimension_semantics = [#tpu.dimension_semantics<parallel>], iteration_bounds = array<i64: 3>, scalar_prefetch = 0 : i64, scratch_operands = 0 : i64, tpu.core_type = #tpu.core_type<tc>, window_params = [{transform_indices = @transform_0, window_bounds = array<i64: 8, 1>}, {pipeline_mode = #tpu.pipeline_mode<synchronous>, transform_indices = @transform_1, window_bounds = array<i64: 256, 128>}, {pipeline_mode = #tpu.pipeline_mode<synchronous>, transform_indices = @transform_2, window_bounds = array<i64: 128, 128>}, {pipeline_mode = #tpu.pipeline_mode<synchronous>, transform_indices = @transform_3, window_bounds = array<i64: 1, 128>}, {pipeline_mode = #tpu.pipeline_mode<synchronous>, transform_indices = @transform_4, window_bounds = array<i64: 128, 128>}, {pipeline_mode = #tpu.pipeline_mode<synchronous>, transform_indices = @transform_5, window_bounds = array<i64: 1, 128>}, {transform_indices = @transform_6, window_bounds = array<i64: 8, 128>}]} {
    %c0 = arith.constant 0 : index
    %c0_0 = arith.constant 0 : index
    %0 = vector.load %arg1[%c0, %c0_0] : memref<8x1xi32, #tpu.memory_space<vmem>>, vector<8x1xi32>
    %1 = tpu.iota {dimensions = array<i32: 1>} : vector<8x256xi32>
    %2 = vector.broadcast %0 : vector<8x1xi32> to vector<8x256xi32>
    %3 = arith.cmpi eq, %1, %2 : vector<8x256xi32>
    %4 = arith.extui %3 : vector<8x256xi1> to vector<8x256xi32>
    %5 = arith.sitofp %4 : vector<8x256xi32> to vector<8x256xf32>
    %6 = arith.truncf %5 : vector<8x256xf32> to vector<8x256xbf16>
    %c0_1 = arith.constant 0 : index
    %c0_2 = arith.constant 0 : index
    %7 = vector.load %arg2[%c0_1, %c0_2] : memref<256x128xbf16, #tpu.memory_space<vmem>>, vector<256x128xbf16>
    %cst = arith.constant dense<0.000000e+00> : vector<8x128xf32>
    %8 = tpu.matmul %6, %7, %cst {dimension_numbers = #tpu.dot_dimension_numbers<[1], [0], [0], [1], [0, 0, 1, 1], [], []>} : vector<8x256xbf16>, vector<256x128xbf16>, vector<8x128xf32> -> vector<8x128xf32>
    %9 = arith.truncf %8 : vector<8x128xf32> to vector<8x128xbf16>
    %c0_3 = arith.constant 0 : index
    %c0_4 = arith.constant 0 : index
    %10 = vector.load %arg3[%c0_3, %c0_4] : memref<128x128xbf16, #tpu.memory_space<vmem>>, vector<128x128xbf16>
    %cst_5 = arith.constant dense<0.000000e+00> : vector<8x128xf32>
    %11 = tpu.matmul %9, %10, %cst_5 {dimension_numbers = #tpu.dot_dimension_numbers<[1], [0], [0], [1], [0, 0, 1, 1], [], []>} : vector<8x128xbf16>, vector<128x128xbf16>, vector<8x128xf32> -> vector<8x128xf32>
    %c0_6 = arith.constant 0 : index
    %c0_7 = arith.constant 0 : index
    %12 = vector.load %arg4[%c0_6, %c0_7] : memref<1x128xf32, #tpu.memory_space<vmem>>, vector<1x128xf32>
    %13 = vector.broadcast %12 : vector<1x128xf32> to vector<8x128xf32>
    %14 = arith.addf %11, %13 : vector<8x128xf32>
    %15 = arith.negf %14 : vector<8x128xf32>
    %16 = math.exp %15 : vector<8x128xf32>
    %cst_8 = arith.constant 1.000000e+00 : f32
    %17 = vector.broadcast %cst_8 : f32 to vector<8x128xf32>
    %18 = arith.addf %17, %16 : vector<8x128xf32>
    %19 = arith.divf %17, %18 : vector<8x128xf32>
    %20 = arith.mulf %14, %19 : vector<8x128xf32>
    %21 = arith.truncf %20 : vector<8x128xf32> to vector<8x128xbf16>
    %c0_9 = arith.constant 0 : index
    %c0_10 = arith.constant 0 : index
    %22 = vector.load %arg5[%c0_9, %c0_10] : memref<128x128xbf16, #tpu.memory_space<vmem>>, vector<128x128xbf16>
    %cst_11 = arith.constant dense<0.000000e+00> : vector<8x128xf32>
    %23 = tpu.matmul %21, %22, %cst_11 {dimension_numbers = #tpu.dot_dimension_numbers<[1], [0], [0], [1], [0, 0, 1, 1], [], []>} : vector<8x128xbf16>, vector<128x128xbf16>, vector<8x128xf32> -> vector<8x128xf32>
    %c0_12 = arith.constant 0 : index
    %c0_13 = arith.constant 0 : index
    %24 = vector.load %arg6[%c0_12, %c0_13] : memref<1x128xf32, #tpu.memory_space<vmem>>, vector<1x128xf32>
    %25 = vector.broadcast %24 : vector<1x128xf32> to vector<8x128xf32>
    %26 = arith.addf %23, %25 : vector<8x128xf32>
    %27 = arith.negf %26 : vector<8x128xf32>
    %28 = math.exp %27 : vector<8x128xf32>
    %cst_14 = arith.constant 1.000000e+00 : f32
    %29 = vector.broadcast %cst_14 : f32 to vector<8x128xf32>
    %30 = arith.addf %29, %28 : vector<8x128xf32>
    %31 = arith.divf %29, %30 : vector<8x128xf32>
    %32 = arith.mulf %26, %31 : vector<8x128xf32>
    %c0_15 = arith.constant 0 : index
    %c0_16 = arith.constant 0 : index
    %33 = vector.load %arg7[%c0_15, %c0_16] : memref<8x128xf32, #tpu.memory_space<vmem>>, vector<8x128xf32>
    tpu.vector_store %arg7[%c0_15, %c0_16], %32 {strides = array<i32>} : memref<8x128xf32, #tpu.memory_space<vmem>>, vector<8x128xf32>,
    return
  }
  func.func @transform_0(%arg0: i32) -> (i32, i32) {
    %c0_i32 = arith.constant 0 : i32
    %c0_i32_0 = arith.constant 0 : i32
    return %arg0, %c0_i32 : i32, i32
  }
  func.func @transform_1(%arg0: i32) -> (i32, i32) {
    %c0_i32 = arith.constant 0 : i32
    %c0_i32_0 = arith.constant 0 : i32
    %c0_i32_1 = arith.constant 0 : i32
    return %c0_i32, %c0_i32_0 : i32, i32
  }
  func.func @transform_2(%arg0: i32) -> (i32, i32) {
    %c0_i32 = arith.constant 0 : i32
    %c0_i32_0 = arith.constant 0 : i32
    %c0_i32_1 = arith.constant 0 : i32
    return %c0_i32, %c0_i32_0 : i32, i32
  }
  func.func @transform_3(%arg0: i32) -> (i32, i32) {
    %c0_i32 = arith.constant 0 : i32
    %c0_i32_0 = arith.constant 0 : i32
    %c0_i32_1 = arith.constant 0 : i32
    return %c0_i32, %c0_i32_0 : i32, i32
  }
  func.func @transform_4(%arg0: i32) -> (i32, i32) {
    %c0_i32 = arith.constant 0 : i32
    %c0_i32_0 = arith.constant 0 : i32
    %c0_i32_1 = arith.constant 0 : i32
    return %c0_i32, %c0_i32_0 : i32, i32
  }
  func.func @transform_5(%arg0: i32) -> (i32, i32) {
    %c0_i32 = arith.constant 0 : i32
    %c0_i32_0 = arith.constant 0 : i32
    %c0_i32_1 = arith.constant 0 : i32
    return %c0_i32, %c0_i32_0 : i32, i32
  }
  func.func @transform_6(%arg0: i32) -> (i32, i32) {
    %c0_i32 = arith.constant 0 : i32
    %c0_i32_0 = arith.constant 0 : i32
    return %arg0, %c0_i32 : i32, i32
  }
}

</mosaic_0001>

<bundles_post_ra>
// kernel: tpu_custom_call.1
= control target key start
LH: loop header
LB: loop body
LE: loop exit
PB: predicated region body
PF: predicated region fallthrough
CT: control target
= control target key end

     0   :  { %11 = vsyncpa [#allocation3], 0  ;;  %s1507_s0 = inlined_call_operand.vmem [shape: s32[24,1], index: 0, kind: input, shape index: {}]   ;;  %s1508_s1 = inlined_call_operand.hbm [shape: bf16[256,128], index: 1, kind: input, shape index: {}]   ;;  %s1509_s2 = inlined_call_operand.hbm [shape: bf16[128,128], index: 2, kind: input, shape index: {}]   ;;  %s1510_s3 = inlined_call_operand.vmem [shape: f32[1,128], index: 3, kind: input, shape index: {}]   ;;  %s1511_s4 = inlined_call_operand.hbm [shape: bf16[128,128], index: 4, kind: input, shape index: {}]   ;;  %s1512_s5 = inlined_call_operand.vmem [shape: f32[1,128], index: 5, kind: input, shape index: {}]   ;;  %s1513_s6 = inlined_call_operand.hbm [shape: f32[24,128], index: 6, kind: output, shape index: {}]  }
   0x1   :  { %12 = vsyncpa [#allocation6], 0 }
   0x2   :  { %13 = vsyncpa [#allocation4], 0 }
   0x3   :  { %15 = vsyncpa [#allocation4 + $0x1], 0  ;;  %s1274_s21 = smov 0   ;;  %s1276_s22 = smov 0  }
   0x4   :  { %s1278_s23 = smov 0   ;;  %s1280_s24 = smov 0  }
   0x5 LB: > { %1518 = sst [smem:[#allocation12_spill]] %s1223_s23  ;;  %s1295_s25 = sadd.s32 4294967295, %s1227_s24   ;;  %s1227_s24 = sphi %s1280_s24, %s1536_s24   ;;  %s1223_s23 = sphi %s1278_s23, %s1533_s23   ;;  %s1219_s22 = sphi %s1276_s22, %s1535_s22   ;;  %s1215_s21 = sphi %s1274_s21, %s1534_s21  }
   0x6   : > { %s818_s26 = sadd.s32 4294967294, %s1227_s24   ;;  %s1299_s27 = sadd.s32 1, %s1227_s24  }
   0x7   : > { %s159_s28 = sadd.s32 1, %s1223_s23  ;;  %s156_s29 = ssub.s32 %s1227_s24, %s1299_s27 }
   0x8   : > { %p169_p0 = scmp.ne.s32.totalorder %s1223_s23, %s1219_s22  ;;  %p157_p1 = scmp.eq.s32.totalorder %s156_s29, 0 }
   0x9   : > { %p170_p2 = scmp.eq.s32.totalorder %s1295_s25, 2  ;;  %p175_p3 = scmp.ne.s32.totalorder %s1219_s22, %s1215_s21 }
   0xa   : > { %p176_p4 = scmp.eq.s32.totalorder %s818_s26, 2  ;;  %p819_p7 = scmp.ge.s32.totalorder %s1227_s24, 1 }
   0xb   : > { %s1310_s30 = scalar_select %p157_p1, %s1223_s23, %s159_s28  }
   0xc   : > { %p1312_p5 = por %p170_p2, %p169_p0  ;;  %p1316_p6 = por %p176_p4, %p175_p3 }
   0xd   : > { %1519 = sst [smem:[#allocation13_spill]] %s1310_s30  ;;  %p183_p8 = scmp.lt.s32.totalorder %s1227_s24, 4 }
   0xe   : > { %s1520_s7 = scalar_select %p1312_p5, 1, 0 }
   0xf   : > { %s1521_s8 = scalar_select %p1316_p6, 1, 0 }
  0x10   : > { %p1514_p9 = scmp.eq.s32.totalorder %s1295_s25, 0  ;;  %p1323_p10 = pnand %p819_p7, %p183_p8 }
  0x11   : > { %s1229_s10 = smov [#allocation5]   ;;  %s1230_s13 = smov [#allocation2]  }
  0x12   : > { %s1522_s9 = scalar_select %p1323_p10, 1, 0 }
  0x13   : > { %p970_p11 = pneg %p1323_p10  ;;  %s208_s11 = sshll.u32 %s1229_s10, 4  ;;  %s1329_s11 = int_to_ptr.vmem [resolvable:$true] %s208_s11 }
  0x14   : > { %s195_s14 = sshll.u32 %s1230_s13, 4  ;;  %s1231_s15 = smov [#allocation7]   ;;  %s1337_s14 = int_to_ptr.vmem [resolvable:$true] %s195_s14 }
  0x15   : > { %p1333_p12 = pnand %p1514_p9, %p970_p11  ;;  %s1339_s16 = sshll.u32 %s1231_s15, 4  ;;  %s225_s16 = int_to_ptr.vmem [resolvable:$true] %s1339_s16 }
  0x16   : > { %s1073_s19 = scalar_lea.hbm %s1509_s2, 1024 }
  0x17   : > { %p1074_p13 = scmp.ne.s32.totalorder %s1509_s2, %s1073_s19  ;;  %p1349_p0 = pneg %p1333_p12 }
  0x18   : > { %p1080_p3 = scmp.lt.u32.totalorder %s1073_s19, %s1509_s2 }
  0x19   : > { %p1076_p1 = pnand %p1349_p0, %p1074_p13 }
  0x1b   : > { %p1077_p2 = pneg %p1076_p1 }
  0x1d   : > { %p1082_p4 = pnand %p1080_p3, %p1077_p2 }
  0x1f   : > { %1085 = shalt.err (!%p1082_p4)
}
  0x20   : > { %s1086_s13 = scalar_lea.vmem %s1329_s11, 1024  ;;  %p1094_p9 = scmp.lt.s32.totalorder %s1329_s11, %s1329_s11 }
  0x21   : > { %p1087_p7 = scmp.ne.s32.totalorder %s1329_s11, %s1086_s13  ;;  %p1095_p6 = scmp.lt.s32.totalorder %s1086_s13, %s1086_s13 }
  0x23   : > { %p1089_p8 = pnand %p1087_p7, %p1349_p0  ;;  %p1096_p13 = por %p1095_p6, %p1094_p9 }
  0x25   : > { %p1090_p11 = pneg %p1089_p8 }
  0x27   : > { %p1097_p1 = pnand %p1096_p13, %p1090_p11 }
  0x29   : > { %1100 = shalt.err (!%p1097_p1)
}
  0x2a   : > { %s1232_s15 = smov 64   ;;  %s1233_s17 = smov 4  }
  0x2b   : > { %976 = dma.hbm_to_vmem [thread:$0]  (!%p1333_p12), %s1509_s2, 1024, %s1329_s11, [#allocation6], %s1232_s15, %s1232_s15, %s1233_s17  }
  0x2c   : > { %s1101_s29 = scalar_lea.hbm %s1508_s1, 2048 }
  0x2d   : > { %p1102_p6 = scmp.ne.s32.totalorder %s1508_s1, %s1101_s29  ;;  %p1108_p3 = scmp.lt.u32.totalorder %s1101_s29, %s1508_s1 }
  0x2f   : > { %p1104_p9 = pnand %p1102_p6, %p1349_p0 }
  0x31   : > { %p1105_p2 = pneg %p1104_p9 }
  0x33   : > { %p1110_p4 = pnand %p1108_p3, %p1105_p2 }
  0x35   : > { %1113 = shalt.err (!%p1110_p4)
}
  0x36   : > { %s1114_s11 = scalar_lea.vmem %s1337_s14, 2048  ;;  %p1122_p13 = scmp.lt.s32.totalorder %s1337_s14, %s1337_s14 }
  0x37   : > { %p1115_p7 = scmp.ne.s32.totalorder %s1337_s14, %s1114_s11  ;;  %p1123_p1 = scmp.lt.s32.totalorder %s1114_s11, %s1114_s11 }
  0x39   : > { %p1117_p8 = pnand %p1115_p7, %p1349_p0  ;;  %p1124_p6 = por %p1123_p1, %p1122_p13 }
  0x3b   : > { %p1118_p11 = pneg %p1117_p8 }
  0x3d   : > { %p1125_p9 = pnand %p1124_p6, %p1118_p11 }
  0x3f   : > { %1128 = shalt.err (!%p1125_p9)
}
  0x40   : > { %973 = dma.hbm_to_vmem [thread:$0]  (!%p1333_p12), %s1508_s1, 2048, %s1337_s14, [#allocation3], %s1232_s15, %s1232_s15, %s1233_s17  }
  0x41   : > { %s1129_s20 = scalar_lea.hbm %s1511_s4, 1024 }
  0x42   : > { %p1130_p2 = scmp.ne.s32.totalorder %s1511_s4, %s1129_s20  ;;  %p1136_p7 = scmp.lt.u32.totalorder %s1129_s20, %s1511_s4 }
  0x44   : > { %p1132_p3 = pnand %p1130_p2, %p1349_p0 }
  0x46   : > { %p1133_p4 = pneg %p1132_p3 }
  0x48   : > { %p1138_p8 = pnand %p1136_p7, %p1133_p4 }
  0x4a   : > { %1141 = shalt.err (!%p1138_p8)
}
  0x4b   : > { %s1142_s11 = scalar_lea.vmem %s225_s16, 1024  ;;  %p1150_p6 = scmp.lt.s32.totalorder %s225_s16, %s225_s16 }
  0x4c   : > { %p1143_p11 = scmp.ne.s32.totalorder %s225_s16, %s1142_s11  ;;  %p1151_p9 = scmp.lt.s32.totalorder %s1142_s11, %s1142_s11 }
  0x4e   : > { %p1145_p13 = pnand %p1143_p11, %p1349_p0  ;;  %p1152_p5 = por %p1151_p9, %p1150_p6 }
  0x50   : > { %p1146_p1 = pneg %p1145_p13 }
  0x52   : > { %p1153_p10 = pnand %p1152_p5, %p1146_p1 }
  0x54   : > { %1156 = shalt.err (!%p1153_p10)
}
  0x55   : > { %979 = dma.hbm_to_vmem [thread:$0]  (!%p1333_p12), %s1511_s4, 1024, %s225_s16, [#allocation6], %s1232_s15, %s1232_s15, %s1233_s17  }
  0x56   : > { %p1525_p2 = scmp.ne.s32.totalorder %s1522_s9, 0 }
  0x57   : > { %p1526_p0 = scmp.eq.s32.totalorder (!%p1525_p2), %s1295_s25, 0 }
  0x58   : > { %250 = sbr.rel (%p1525_p2) target bundleno = 955 (0x3bb), region = 44 }
  0x5f   : > { %1202 = dma.done.wait (%p1526_p0), [#allocation3], 2048   ;;  %p1527_p3 = pmov %p1526_p0 }
  0x60   : > { %p1528_p5 = pmov %p1526_p0 }
  0x61   : > { %1204 = vsyncadd (%p1527_p3), [#allocation3], 4294965248 }
  0x62   : > { %1206 = dma.done.wait (%p1528_p5), [#allocation6], 2048   ;;  %p1529_p10 = pmov %p1526_p0 }
  0x63   : > { %p287_p4 = scmp.lt.s32.totalorder %s1295_s25, 2  ;;  %v1234_v0 = vmov 0   ;;  %v1033_v2 = vld [vmem:[#allocation2 + $0x40] sm:$0xff]   ;;  %v1035_v4 = vld [vmem:[#allocation2 + $0x48] sm:$0xff]   ;;  %v1037_v6 = vld [vmem:[#allocation2 + $0x50] sm:$0xff]   ;;  %v1235_v7 = vmov 0.0   ;;  %v293_v26 = vlaneseq }
  0x64   : > { %1208 = vsyncadd (%p1529_p10), [#allocation6], 4294965248  ;;  %1032 = vset.pattern.permute.xlu0 %v1234_v0  ;;  %v1034_v3 = vld [vmem:[#allocation2] sm:$0xff]   ;;  %876 = vmatprep.subr.bf16.mxu0 %v1033_v2  ;;  %v1036_v5 = vld [vmem:[#allocation2 + $0x8] sm:$0xff]   ;;  %v1236_v30 = vmov 1.0|1.0  }
  0x65   : > { %s288_s12 = scalar_select %p287_p4, %s1295_s25, 2  ;;  %877 = vmatpush3.bf16.msra.mxu0 %v1034_v3  ;;  %916 = vmatprep.subr.bf16.mxu1 %v1235_v7  ;;  %v1038_v8 = vld [vmem:[#allocation2 + $0x10] sm:$0xff]   ;;  %v1039_v9 = vld [vmem:[#allocation2 + $0x58] sm:$0xff]   ;;  %v1041_v11 = vld [vmem:[#allocation2 + $0x60] sm:$0xff]   ;;  %v294_v27 = vand.u32 127, %v293_v26  ;;  %vm1237_vm4 = vmmov 0  }
  0x66   : > { %878 = vmatprep.subr.bf16.mxu0 %v1035_v4  ;;  %v1040_v10 = vld [vmem:[#allocation2 + $0x18] sm:$0xff]   ;;  %v1042_v12 = vld [vmem:[#allocation2 + $0x20] sm:$0xff]   ;;  %v1043_v13 = vld [vmem:[#allocation2 + $0x68] sm:$0xff]   ;;  %932 = vmatprep.mubr.msk.bf16.mxu1 %vm1237_vm4, %v1235_v7  ;;  %s284_s20 = sand.u32 1, %s1219_s22   ;;  %s873_s29 = sshll.u32 %s1295_s25, 7 }
  0x67   : > { %s829_s9 = sshll.u32 %s288_s12, 3  ;;  %v1049_v14 = vld [vmem:[#allocation5] sm:$0xff]   ;;  %v1050_v15 = vld [vmem:[#allocation5 + $0x8] sm:$0xff]   ;;  %v1045_v17 = vld [vmem:[#allocation2 + $0x70] sm:$0xff]   ;;  %v295_v28 = vadd.s32 128, %v294_v27  ;;  %s828_s26 = sshll.u32 %s284_s20, 3 }
  0x68   : > { %s290_s15 = scalar_lea.vmem %s1507_s0, %s829_s9  ;;  %917 = vmatpush3.bf16.msra.mxu1 %v1049_v14  ;;  %v1044_v16 = vld [vmem:[#allocation2 + $0x28] sm:$0xff]   ;;  %v1046_v18 = vld [vmem:[#allocation2 + $0x30] sm:$0xff]   ;;  %v1047_v20 = vld [vmem:[#allocation2 + $0x78] sm:$0xff]   ;;  %s286_s10 = scalar_lea.vmem [#allocation8], %s828_s26 }
  0x69   : > { %v292_v1 = vld [vmem:[%s290_s15] sm:$0xff]  ;;  %879 = vmatpush3.bf16.msra.mxu0 %v1036_v5  ;;  %918 = vmatprep.subr.bf16.mxu1 %v1235_v7  ;;  %v1051_v19 = vld [vmem:[#allocation5 + $0x10] sm:$0xff]   ;;  %v1052_v21 = vld [vmem:[#allocation5 + $0x18] sm:$0xff]   ;;  %s728_s13 = sshll.u32 %s286_s10, 4  ;;  %s1465_s23 = scalar_lea.hbm %s1513_s6, %s873_s29  ;;  %s1467_s13 = int_to_ptr.vmem [resolvable:$true] %s728_s13 }
  0x6a   : > { %297 = vperm.xlu0 %1032, %v292_v1   ;;  %880 = vmatprep.subr.bf16.mxu0 %v1037_v6  ;;  %v1048_v22 = vld [vmem:[#allocation2 + $0x38] sm:$0xff]   ;;  %v1053_v23 = vld [vmem:[#allocation5 + $0x20] sm:$0xff]   ;;  %v1054_v24 = vld [vmem:[#allocation5 + $0x28] sm:$0xff]   ;;  %s715_s12 = scalar_lea.sflag [#allocation4], %s284_s20  ;;  %s1157_s9 = scalar_lea.vmem %s1467_s13, 128 }
  0x6b   : > { %v1055_v25 = vld [vmem:[#allocation5 + $0x30] sm:$0xff]   ;;  %v1056_v31 = vld [vmem:[#allocation5 + $0x38] sm:$0xff]   ;;  %v1057_v38 = vld [vmem:[#allocation7] sm:$0xff]   ;;  %p1158_p12 = scmp.ne.s32.totalorder %s1467_s13, %s1157_s9  ;;  %p1530_p7 = scmp.ne.s32.totalorder %s1520_s7, 0 }
  0x6c   : > { %919 = vmatpush3.bf16.msra.mxu1 %v1050_v15  ;;  %v1058_v39 = vld [vmem:[#allocation7 + $0x8] sm:$0xff]   ;;  %v1059_v40 = vld [vmem:[#allocation7 + $0x10] sm:$0xff]   ;;  %v1060_v41 = vld [vmem:[#allocation7 + $0x18] sm:$0xff]   ;;  %s1238_s25 = smov [#allocation8]  }
  0x6d   : > { %881 = vmatpush3.bf16.msra.mxu0 %v1038_v8  ;;  %920 = vmatprep.subr.bf16.mxu1 %v1235_v7  ;;  %v1061_v42 = vld [vmem:[#allocation7 + $0x20] sm:$0xff]   ;;  %v1062_v43 = vld [vmem:[#allocation7 + $0x28] sm:$0xff]   ;;  %v1063_v44 = vld [vmem:[#allocation7 + $0x30] sm:$0xff]   ;;  %p1159_p8 = pnand %p1158_p12, %p1530_p7  ;;  %s1161_s16 = sshll.u32 %s1238_s25, 4  ;;  %s1162_s16 = int_to_ptr.vmem [resolvable:$false] %s1161_s16 }
  0x6e   : > { %882 = vmatprep.subr.bf16.mxu0 %v1039_v9  ;;  %v1064_v45 = vld [vmem:[#allocation7 + $0x38] sm:$0xff]   ;;  %v852_v46 = vld [vmem:[%s1510_s3] ss:$0 sm:$0xff]  ;;  %s1163_s28 = scalar_lea.vmem %s1162_s16, 256  ;;  %p1164_p13 = scmp.lt.s32.totalorder %s1467_s13, %s1162_s16 }
  0x6f   : > { %v862_v58 = vld [vmem:[%s1512_s5] ss:$0 sm:$0xff]  ;;  %p1160_p11 = pneg %p1159_p8  ;;  %p1165_p1 = scmp.lt.s32.totalorder %s1163_s28, %s1157_s9 }
  0x70   : > { %921 = vmatpush3.bf16.msra.mxu1 %v1051_v19 }
  0x71   : > { %883 = vmatpush3.bf16.msra.mxu0 %v1040_v10  ;;  %922 = vmatprep.subr.bf16.mxu1 %v1235_v7  ;;  %p1166_p6 = por %p1165_p1, %p1164_p13 }
  0x72   : > { %884 = vmatprep.subr.bf16.mxu0 %v1041_v11 }
  0x73   : > { %p1167_p9 = pnand %p1166_p6, %p1160_p11 }
  0x74   : > { %923 = vmatpush3.bf16.msra.mxu1 %v1052_v21 }
  0x75   : > { %885 = vmatpush3.bf16.msra.mxu0 %v1042_v12  ;;  %924 = vmatprep.subr.bf16.mxu1 %v1235_v7 }
  0x76   : > { %886 = vmatprep.subr.bf16.mxu0 %v1043_v13 }
  0x78   : > { %925 = vmatpush3.bf16.msra.mxu1 %v1053_v23 }
  0x79   : > { %887 = vmatpush3.bf16.msra.mxu0 %v1044_v16  ;;  %926 = vmatprep.subr.bf16.mxu1 %v1235_v7 }
  0x7a   : > { %888 = vmatprep.subr.bf16.mxu0 %v1045_v17 }
  0x7c   : > { %927 = vmatpush3.bf16.msra.mxu1 %v1054_v24 }
  0x7d   : > { %889 = vmatpush3.bf16.msra.mxu0 %v1046_v18  ;;  %928 = vmatprep.subr.bf16.mxu1 %v1235_v7 }
  0x7e   : > { %890 = vmatprep.subr.bf16.mxu0 %v1047_v20 }
  0x80   : > { %929 = vmatpush3.bf16.msra.mxu1 %v1055_v25 }
  0x81   : > { %891 = vmatpush3.bf16.msra.mxu0 %v1048_v22  ;;  %930 = vmatprep.subr.bf16.mxu1 %v1235_v7 }
  0x82   : > { %936 = vmatprep.subr.bf16.mxu0 %v1235_v7 }
  0x84   : > { %931 = vmatpush3.bf16.msra.mxu1 %v1056_v31 }
  0xe9   : > { %v298_v29 = vpop.permute.xlu0 %297 }
  0xea   : > { %vm299_vm0 = vcmp.eq.s32.totalorder %v294_v27, %v298_v29  ;;  %vm300_vm1 = vcmp.eq.s32.totalorder %v295_v28, %v298_v29 }
  0xeb   : > { %vm850_vm2 = vmpackc.low %vm299_vm0, %vm299_vm0 }
  0xec   : > { %vm848_vm3 = vmpackc.low %vm300_vm1, %vm300_vm1 }
  0xed   : > { %849 = vmatprep.mubr.msk.bf16.mxu0 %vm848_vm3, %v1236_v30 }
  0xee   : > { %851 = vmatmul.mubr.msk.bf16.vlgmr.msra.gmra.mrb[0].mxu0 %vm850_vm2, %v1236_v30 }
  0xef   : > { %952 = vmatprep.mubr.msk.bf16.mxu0 %vm1237_vm4, %v1235_v7  ;;  %937 = vmatpush3.bf16.msra.mxu0 %v1057_v38 }
  0xf0   : > { %938 = vmatprep.subr.bf16.mxu0 %v1235_v7 }
  0xf3   : > { %939 = vmatpush3.bf16.msra.mxu0 %v1058_v39 }
  0xf4   : > { %940 = vmatprep.subr.bf16.mxu0 %v1235_v7 }
  0xf7   : > { %941 = vmatpush3.bf16.msra.mxu0 %v1059_v40 }
  0xf8   : > { %942 = vmatprep.subr.bf16.mxu0 %v1235_v7 }
  0xfb   : > { %943 = vmatpush3.bf16.msra.mxu0 %v1060_v41 }
  0xfc   : > { %944 = vmatprep.subr.bf16.mxu0 %v1235_v7 }
  0xff   : > { %945 = vmatpush3.bf16.msra.mxu0 %v1061_v42 }
 0x100   : > { %946 = vmatprep.subr.bf16.mxu0 %v1235_v7 }
 0x103   : > { %947 = vmatpush3.bf16.msra.mxu0 %v1062_v43 }
 0x104   : > { %948 = vmatprep.subr.bf16.mxu0 %v1235_v7 }
 0x107   : > { %949 = vmatpush3.bf16.msra.mxu0 %v1063_v44 }
 0x108   : > { %950 = vmatprep.subr.bf16.mxu0 %v1235_v7 }
 0x10b   : > { %951 = vmatpush3.bf16.msra.mxu0 %v1064_v45 }
 0x1c1   : > { %v892_v32 = vpop.f32.mrb[0].mxu0 }
 0x1c2   : > { %v893_v33 = vpop.f32.mrb[1].mxu0 }
 0x1c3   : > { %v894_v34 = vadd.f32 %v893_v33, %v892_v32  ;;  %v895_v35 = vpop.f32.mrb[2].mxu0 }
 0x1c4   : > { %v896_v36 = vpop.f32.mrb[3].mxu0 }
 0x1c5   : > { %v475_v37 = vpack.c.bf16 %v894_v34, %v894_v34 }
 0x1c7   : > { %933 = vmatmul.mubr.bf16.vlgmr.msra.gmra.mrb[0].mxu1 %v475_v37 }
 0x29a   : > { %v581_v47 = vpop.f32.mrb[0].mxu1 }
 0x29b   : > { %v582_v48 = vadd.f32 %v852_v46, %v581_v47  ;;  %v934_v49 = vpop.f32.mrb[1].mxu1 }
 0x29c   : > { %v584_v50 = vpop.f32.mrb[2].mxu1 }
 0x29d   : > { %v861_v51 = vmul.f32 -1.442695, %v582_v48  ;;  %v935_v52 = vpop.f32.mrb[3].mxu1 }
 0x29f   : > { %1065 = vpow2.f32 %v861_v51 }
 0x2a9   : > { %v1066_v53 = vpop.eup %1065 }
 0x2aa   : > { %v590_v54 = vadd.f32 1.0, %v1066_v53 }
 0x2ac   : > { %1067 = vrcp.f32 %v590_v54 }
 0x2b6   : > { %v1068_v55 = vpop.eup %1067 }
 0x2b7   : > { %v593_v56 = vmul.f32 %v1068_v55, %v582_v48 }
 0x2b9   : > { %v594_v57 = vpack.c.bf16 %v593_v56, %v593_v56 }
 0x2bb   : > { %953 = vmatmul.mubr.bf16.vlgmr.msra.gmra.mrb[4].mxu0 %v594_v57 }
 0x38e   : > { %v700_v59 = vpop.f32.mrb[4].mxu0 }
 0x38f   : > { %v701_v60 = vadd.f32 %v862_v58, %v700_v59  ;;  %v954_v61 = vpop.f32.mrb[5].mxu0 }
 0x390   : > { %v703_v62 = vpop.f32.mrb[6].mxu0 }
 0x391   : > { %v871_v63 = vmul.f32 -1.442695, %v701_v60  ;;  %v955_v0 = vpop.f32.mrb[7].mxu0 }
 0x393   : > { %1069 = vpow2.f32 %v871_v63 }
 0x39d   : > { %v1070_v1 = vpop.eup %1069 }
 0x39e   : > { %v709_v2 = vadd.f32 1.0, %v1070_v1 }
 0x3a0   : > { %1071 = vrcp.f32 %v709_v2 }
 0x3aa   : > { %v1072_v3 = vpop.eup %1071 }
 0x3ab   : > { %v712_v4 = vmul.f32 %v1072_v3, %v701_v60 }
 0x3ad   : > { %713 = vst [vmem:[%s286_s10] sm:$0xff] %v712_v4 }
 0x3ae   : > { %1170 = shalt.err (!%p1167_p9)
}
 0x3af   : > { %s1171_s15 = scalar_lea.hbm %s1465_s23, 128  ;;  %s1175_s18 = scalar_lea.hbm %s1513_s6, 384 }
 0x3b0   : > { %p1172_p2 = scmp.ne.s32.totalorder %s1465_s23, %s1171_s15  ;;  %p1176_p5 = scmp.lt.u32.totalorder %s1465_s23, %s1513_s6 }
 0x3b1   : > { %p1177_p10 = scmp.lt.u32.totalorder %s1175_s18, %s1171_s15  ;;  %p1179_p12 = scmp.lt.u32.totalorder %s1171_s15, %s1465_s23 }
 0x3b2   : > { %p1173_p0 = pnand %p1172_p2, %p1530_p7 }
 0x3b3   : > { %p1178_p4 = por %p1177_p10, %p1176_p5 }
 0x3b4   : > { %p1174_p3 = pneg %p1173_p0 }
 0x3b5   : > { %p1180_p8 = por %p1179_p12, %p1178_p4 }
 0x3b7   : > { %p1181_p11 = pnand %p1180_p8, %p1174_p3 }
 0x3b9   : > { %1184 = shalt.err (!%p1181_p11)
}
 0x3ba   : > { %968 = dma.vmem_to_hbm [thread:$0]  (%p1530_p7), %s1467_s13, 128, %s1465_s23, %s715_s12  }
 0x3bb PF: > { %p990_p13 = scmp.ge.s32.totalorder %s1227_s24, 2  ;;  %s740_s26 = sand.u32 1, %s1215_s21  }
 0x3bc   : > { %p1531_p1 = scmp.ne.s32.totalorder %s1521_s8, 0  ;;  %s741_s29 = scalar_lea.sflag [#allocation4], %s740_s26 }
 0x3be   : > { %p981_p6 = pnand %p990_p13, %p1531_p1 }
 0x3c0   : > { %1210 = dma.done.wait (!%p981_p6), %s741_s29, 128  }
 0x3c1   : > { %1212 = vsyncadd (!%p981_p6), %s741_s29, 4294967168  ;;  %s1532_s10 = sld [smem:[#allocation12_spill]]  ;;  %s1533_s23 = sld [smem:[#allocation13_spill]] }
 0x3c2   : > { %p18_p9 = scmp.ge.s32.totalorder %s1299_s27, 5   ;;  %s1534_s21 = smov %s1219_s22 }
 0x3c3   : > { %s1536_s24 = smov %s1299_s27 }
 0x3c4   :  { %20 = sbr.rel (!%p18_p9) target bundleno = 5 (0x5), region = 92 }
 0x3c7   : > { %s1535_s22 = smov %s1532_s10 }
 0x3cb   :  { %746 = vsyncpa [#allocation3], 1 }
 0x3cc   :  { %748 = vsyncpa [#allocation3 + $0x1], 1 }
 0x3cd   :  { %749 = vsyncpa [#allocation6], 1 }
 0x3ce   :  { %750 = vsyncpa [#allocation4], 1 }
 0x3cf   :  { %752 = vsyncpa [#allocation4 + $0x1], 1 }

</bundles_post_ra>
